<compile_context>
chip_gen: v7x
topology: tpu7x:2x2x1
jax: 0.10.0
libtpu: 0.0.40
codegen_flags: <defaults>
</compile_context>

<pallas_src>
import jax
import jax.numpy as jnp
from jax.experimental import pallas as pl
from jax.experimental.pallas import tpu as pltpu


# ----------------------------- Pallas kernel --------------------------------
def gru_recurrent_kernel(gi_ref, whh_ref, bhn_ref, out_ref, h_scratch):
    """One grid step processes T_CHUNK timesteps.

    gi_ref : (T_CHUNK, B, 3H)  precomputed x @ W_ih^T + b_ih + [b_hr, b_hz, 0]
    whh_ref: (H, 3H)           fused hidden-to-hidden weights (lane-dense)
    bhn_ref: (1, H)            hidden bias of the n-gate (stays inside r*(...))
    out_ref: (T_CHUNK, B, H)   hidden state at every timestep of the chunk
    h_scratch: (B, H)          persistent hidden state across grid steps
    """
    H = h_scratch.shape[-1]
    t_chunk = out_ref.shape[0]

    @pl.when(pl.program_id(0) == 0)
    def _():
        h_scratch[...] = jnp.zeros_like(h_scratch)

    whh = whh_ref[...]          # hoisted: loop-invariant
    bhn = bhn_ref[...]

    def step(t, h):
        gi = gi_ref[t]                                                # (B, 3H)
        gh = jnp.dot(h, whh, preferred_element_type=jnp.float32)      # (B, 3H)
        r = jax.nn.sigmoid(gi[:, :H] + gh[:, :H])
        z = jax.nn.sigmoid(gi[:, H:2 * H] + gh[:, H:2 * H])
        n = jnp.tanh(gi[:, 2 * H:] + r * (gh[:, 2 * H:] + bhn))
        h_new = (1.0 - z) * n + z * h
        out_ref[t] = h_new.astype(out_ref.dtype)
        return h_new

    h_scratch[...] = jax.lax.fori_loop(0, t_chunk, step, h_scratch[...],
                                       unroll=True)


# ------------------------------ wrapper --------------------------------------
def gru_pallas(x_emb, w_ih, w_hh, b_ih, b_hh, *, t_chunk=8):
    """x_emb: (S, B, E) f32; PyTorch-layout GRU params (3H,E),(3H,H),(3H,),(3H,)."""
    S, B, E = x_emb.shape
    H = w_hh.shape[1]

    # ---- hoisted input projection: one large MXU-friendly matmul (XLA) ----
    w_ih_fused = w_ih.T                                               # (E, 3H)
    # pre-add b_ih and the r/z parts of b_hh; the n-gate hidden bias must stay
    # inside the r*(...) term (PyTorch GRU semantics), so it goes to the kernel.
    b_comb = b_ih + jnp.concatenate([b_hh[:2 * H], jnp.zeros((H,), b_hh.dtype)])
    gi = jnp.einsum('sbe,eg->sbg', x_emb, w_ih_fused) + b_comb        # (S, B, 3H)

    # ---- pad seq to a multiple of t_chunk, batch to a multiple of 8 ----
    S_pad = ((S + t_chunk - 1) // t_chunk) * t_chunk
    B_pad = ((B + 7) // 8) * 8
    gi = jnp.pad(gi, ((0, S_pad - S), (0, B_pad - B), (0, 0)))

    whh_fused = jnp.asarray(w_hh.T)                                   # (H, 3H)
    bhn = b_hh[2 * H:].reshape(1, H)
    n_chunks = S_pad // t_chunk

    grid_spec = pltpu.PrefetchScalarGridSpec(
        num_scalar_prefetch=0,
        grid=(n_chunks,),
        in_specs=[
            pl.BlockSpec((t_chunk, B_pad, 3 * H), lambda c: (c, 0, 0)),  # gi chunk
            pl.BlockSpec((H, 3 * H), lambda c: (0, 0)),                  # W_hh fused
            pl.BlockSpec((1, H), lambda c: (0, 0)),                      # b_hn
        ],
        out_specs=pl.BlockSpec((t_chunk, B_pad, H), lambda c: (c, 0, 0)),
        scratch_shapes=[pltpu.VMEM((B_pad, H), jnp.float32)],
    )

    cost = pl.CostEstimate(
        flops=2 * S_pad * B_pad * H * 3 * H + 12 * S_pad * B_pad * H,
        transcendentals=3 * S_pad * B_pad * H,
        bytes_accessed=4 * (S_pad * B_pad * 3 * H          # gi in
                            + S_pad * B_pad * H            # outputs
                            + H * 3 * H + H),              # weights / bias
    )

    outputs = pl.pallas_call(
        gru_recurrent_kernel,
        out_shape=jax.ShapeDtypeStruct((S_pad, B_pad, H), jnp.float32),
        grid_spec=grid_spec,
        compiler_params=pltpu.CompilerParams(
            dimension_semantics=("arbitrary",)),   # time chunks are sequential
        cost_estimate=cost,
    )(gi, whh_fused, bhn)

    outputs = outputs[:S, :B]
    hidden = outputs[S - 1:S]                      # (1, B, H) final hidden state
    return outputs, hidden


def encoder_forward(token_ids, params):
    """token_ids: (S, B) int32 -> (outputs (S,B,H), hidden (1,B,H))."""
    emb = jnp.take(params["embedding"], token_ids, axis=0)   # (S, B, E)
    # TODO(synk): nn.Dropout(0.5) is stochastic in train mode; implemented as
    # identity (eval-mode semantics) for deterministic reproduction.
    return gru_pallas(emb,
                      params["w_ih"], params["w_hh"],
                      params["b_ih"], params["b_hh"])


# -------------------------- pure-JAX reference --------------------------------
def encoder_reference(token_ids, params):
    emb = jnp.take(params["embedding"], token_ids, axis=0)
    S, B, E = emb.shape
    H = params["w_hh"].shape[1]
    w_ih, w_hh, b_ih, b_hh = (params["w_ih"], params["w_hh"],
                              params["b_ih"], params["b_hh"])

    def step(h, x):
        gi = x @ w_ih.T + b_ih
        gh = h @ w_hh.T + b_hh
        r = jax.nn.sigmoid(gi[:, :H] + gh[:, :H])
        z = jax.nn.sigmoid(gi[:, H:2 * H] + gh[:, H:2 * H])
        n = jnp.tanh(gi[:, 2 * H:] + r * gh[:, 2 * H:])
        h_new = (1.0 - z) * n + z * h
        return h_new, h_new

    h0 = jnp.zeros((B, H), jnp.float32)
    h_last, outs = jax.lax.scan(step, h0, emb)
    return outs, h_last[None]


# --------------------------------- main ---------------------------------------
if __name__ == "__main__":
    vocab_size, embed_dim, hidden_size = 32, 16, 32
    seq_len, batch = 8, 2

    key = jax.random.PRNGKey(0)
    k_emb, k_wih, k_whh, k_bih, k_bhh, k_tok = jax.random.split(key, 6)
    bound = 1.0 / jnp.sqrt(hidden_size)

    params = {
        "embedding": jax.random.normal(k_emb, (vocab_size, embed_dim), jnp.float32),
        "w_ih": jax.random.uniform(k_wih, (3 * hidden_size, embed_dim),
                                   jnp.float32, -bound, bound),
        "w_hh": jax.random.uniform(k_whh, (3 * hidden_size, hidden_size),
                                   jnp.float32, -bound, bound),
        "b_ih": jax.random.uniform(k_bih, (3 * hidden_size,),
                                   jnp.float32, -bound, bound),
        "b_hh": jax.random.uniform(k_bhh, (3 * hidden_size,),
                                   jnp.float32, -bound, bound),
    }

    token_ids = jax.random.randint(k_tok, (seq_len, batch), 0, vocab_size, jnp.int32)

    outputs, hidden = encoder_forward(token_ids, params)
    outputs = jax.block_until_ready(outputs)
    hidden = jax.block_until_ready(hidden)

    ref_out, ref_hid = encoder_reference(token_ids, params)
    assert outputs.shape == (seq_len, batch, hidden_size)
    assert hidden.shape == (1, batch, hidden_size)
    assert jnp.allclose(outputs, ref_out, atol=1e-4, rtol=1e-4)
    assert jnp.allclose(hidden, ref_hid, atol=1e-4, rtol=1e-4)

    print("KERNEL_OK")
</pallas_src>

<mosaic_0001>
module attributes {stable_mosaic.version = 11 : i64} {
  func.func @gru_recurrent_kernel(%arg0: i32, %arg1: memref<8x8x96xf32, #tpu.memory_space<vmem>>, %arg2: memref<32x96xf32, #tpu.memory_space<vmem>>, %arg3: memref<1x32xf32, #tpu.memory_space<vmem>>, %arg4: memref<8x8x32xf32, #tpu.memory_space<vmem>>, %arg5: memref<8x32xf32, #tpu.memory_space<vmem>>) attributes {dimension_semantics = [#tpu.dimension_semantics<arbitrary>], iteration_bounds = array<i64: 1>, scalar_prefetch = 0 : i64, scratch_operands = 1 : i64, tpu.core_type = #tpu.core_type<tc>, window_params = [{transform_indices = @transform_0, window_bounds = array<i64: 8, 8, 96>}, {pipeline_mode = #tpu.pipeline_mode<synchronous>, transform_indices = @transform_1, window_bounds = array<i64: 32, 96>}, {pipeline_mode = #tpu.pipeline_mode<synchronous>, transform_indices = @transform_2, window_bounds = array<i64: 1, 32>}, {transform_indices = @transform_3, window_bounds = array<i64: 8, 8, 32>}]} {
    %c0_i32 = arith.constant 0 : i32
    %0 = arith.cmpi eq, %arg0, %c0_i32 : i32
    %1 = arith.extui %0 : i1 to i32
    %c0_i32_0 = arith.constant 0 : i32
    %2 = arith.cmpi ne, %1, %c0_i32_0 : i32
    scf.if %2 {
      %cst_72 = arith.constant 0.000000e+00 : f32
      %295 = vector.broadcast %cst_72 : f32 to vector<8x32xf32>
      %c0_73 = arith.constant 0 : index
      %c0_74 = arith.constant 0 : index
      %296 = vector.load %arg5[%c0_73, %c0_74] : memref<8x32xf32, #tpu.memory_space<vmem>>, vector<8x32xf32>
      tpu.vector_store %arg5[%c0_73, %c0_74], %295 {strides = array<i32>} : memref<8x32xf32, #tpu.memory_space<vmem>>, vector<8x32xf32>,
    } else {
    }
    %c0 = arith.constant 0 : index
    %c0_1 = arith.constant 0 : index
    %3 = vector.load %arg2[%c0, %c0_1] : memref<32x96xf32, #tpu.memory_space<vmem>>, vector<32x96xf32>
    %c0_2 = arith.constant 0 : index
    %c0_3 = arith.constant 0 : index
    %4 = vector.load %arg3[%c0_2, %c0_3] : memref<1x32xf32, #tpu.memory_space<vmem>>, vector<1x32xf32>
    %c0_4 = arith.constant 0 : index
    %c0_5 = arith.constant 0 : index
    %5 = vector.load %arg5[%c0_4, %c0_5] : memref<8x32xf32, #tpu.memory_space<vmem>>, vector<8x32xf32>
    %c0_i32_6 = arith.constant 0 : i32
    %6 = arith.index_cast %c0_i32_6 : i32 to index
    %c0_7 = arith.constant 0 : index
    %c0_8 = arith.constant 0 : index
    %7 = vector.load %arg1[%6, %c0_7, %c0_8] : memref<8x8x96xf32, #tpu.memory_space<vmem>>, vector<1x8x96xf32>
    %8 = vector.shape_cast %7 : vector<1x8x96xf32> to vector<8x96xf32>
    %cst = arith.constant dense<0.000000e+00> : vector<8x96xf32>
    %9 = tpu.matmul %5, %3, %cst {dimension_numbers = #tpu.dot_dimension_numbers<[1], [0], [0], [1], [0, 0, 1, 1], [], []>} : vector<8x32xf32>, vector<32x96xf32>, vector<8x96xf32> -> vector<8x96xf32>
    %10 = vector.extract_strided_slice %8 {offsets = [0, 0], sizes = [8, 32], strides = [1, 1]} : vector<8x96xf32> to vector<8x32xf32>
    %11 = vector.extract_strided_slice %9 {offsets = [0, 0], sizes = [8, 32], strides = [1, 1]} : vector<8x96xf32> to vector<8x32xf32>
    %12 = arith.addf %10, %11 : vector<8x32xf32>
    %13 = arith.negf %12 : vector<8x32xf32>
    %14 = math.exp %13 : vector<8x32xf32>
    %cst_9 = arith.constant 1.000000e+00 : f32
    %15 = vector.broadcast %cst_9 : f32 to vector<8x32xf32>
    %16 = arith.addf %15, %14 : vector<8x32xf32>
    %17 = arith.divf %15, %16 : vector<8x32xf32>
    %18 = vector.extract_strided_slice %8 {offsets = [0, 32], sizes = [8, 32], strides = [1, 1]} : vector<8x96xf32> to vector<8x32xf32>
    %19 = vector.extract_strided_slice %9 {offsets = [0, 32], sizes = [8, 32], strides = [1, 1]} : vector<8x96xf32> to vector<8x32xf32>
    %20 = arith.addf %18, %19 : vector<8x32xf32>
    %21 = arith.negf %20 : vector<8x32xf32>
    %22 = math.exp %21 : vector<8x32xf32>
    %cst_10 = arith.constant 1.000000e+00 : f32
    %23 = vector.broadcast %cst_10 : f32 to vector<8x32xf32>
    %24 = arith.addf %23, %22 : vector<8x32xf32>
    %25 = arith.divf %23, %24 : vector<8x32xf32>
    %26 = vector.extract_strided_slice %8 {offsets = [0, 64], sizes = [8, 32], strides = [1, 1]} : vector<8x96xf32> to vector<8x32xf32>
    %27 = vector.extract_strided_slice %9 {offsets = [0, 64], sizes = [8, 32], strides = [1, 1]} : vector<8x96xf32> to vector<8x32xf32>
    %28 = vector.broadcast %4 : vector<1x32xf32> to vector<8x32xf32>
    %29 = arith.addf %27, %28 : vector<8x32xf32>
    %30 = arith.mulf %17, %29 : vector<8x32xf32>
    %31 = arith.addf %26, %30 : vector<8x32xf32>
    %32 = math.tanh %31 : vector<8x32xf32>
    %cst_11 = arith.constant 1.000000e+00 : f32
    %33 = vector.broadcast %cst_11 : f32 to vector<8x32xf32>
    %34 = arith.subf %33, %25 : vector<8x32xf32>
    %35 = arith.mulf %34, %32 : vector<8x32xf32>
    %36 = arith.mulf %25, %5 : vector<8x32xf32>
    %37 = arith.addf %35, %36 : vector<8x32xf32>
    %38 = arith.index_cast %c0_i32_6 : i32 to index
    %c0_12 = arith.constant 0 : index
    %c0_13 = arith.constant 0 : index
    %39 = vector.load %arg4[%38, %c0_12, %c0_13] : memref<8x8x32xf32, #tpu.memory_space<vmem>>, vector<1x8x32xf32>
    %40 = vector.shape_cast %39 : vector<1x8x32xf32> to vector<8x32xf32>
    %41 = vector.shape_cast %37 : vector<8x32xf32> to vector<1x8x32xf32>
    tpu.vector_store %arg4[%38, %c0_12, %c0_13], %41 {strides = array<i32>} : memref<8x8x32xf32, #tpu.memory_space<vmem>>, vector<1x8x32xf32>,
    %c1_i32 = arith.constant 1 : i32
    %42 = arith.index_cast %c1_i32 : i32 to index
    %c0_14 = arith.constant 0 : index
    %c0_15 = arith.constant 0 : index
    %43 = vector.load %arg1[%42, %c0_14, %c0_15] : memref<8x8x96xf32, #tpu.memory_space<vmem>>, vector<1x8x96xf32>
    %44 = vector.shape_cast %43 : vector<1x8x96xf32> to vector<8x96xf32>
    %cst_16 = arith.constant dense<0.000000e+00> : vector<8x96xf32>
    %45 = tpu.matmul %37, %3, %cst_16 {dimension_numbers = #tpu.dot_dimension_numbers<[1], [0], [0], [1], [0, 0, 1, 1], [], []>} : vector<8x32xf32>, vector<32x96xf32>, vector<8x96xf32> -> vector<8x96xf32>
    %46 = vector.extract_strided_slice %44 {offsets = [0, 0], sizes = [8, 32], strides = [1, 1]} : vector<8x96xf32> to vector<8x32xf32>
    %47 = vector.extract_strided_slice %45 {offsets = [0, 0], sizes = [8, 32], strides = [1, 1]} : vector<8x96xf32> to vector<8x32xf32>
    %48 = arith.addf %46, %47 : vector<8x32xf32>
    %49 = arith.negf %48 : vector<8x32xf32>
    %50 = math.exp %49 : vector<8x32xf32>
    %cst_17 = arith.constant 1.000000e+00 : f32
    %51 = vector.broadcast %cst_17 : f32 to vector<8x32xf32>
    %52 = arith.addf %51, %50 : vector<8x32xf32>
    %53 = arith.divf %51, %52 : vector<8x32xf32>
    %54 = vector.extract_strided_slice %44 {offsets = [0, 32], sizes = [8, 32], strides = [1, 1]} : vector<8x96xf32> to vector<8x32xf32>
    %55 = vector.extract_strided_slice %45 {offsets = [0, 32], sizes = [8, 32], strides = [1, 1]} : vector<8x96xf32> to vector<8x32xf32>
    %56 = arith.addf %54, %55 : vector<8x32xf32>
    %57 = arith.negf %56 : vector<8x32xf32>
    %58 = math.exp %57 : vector<8x32xf32>
    %cst_18 = arith.constant 1.000000e+00 : f32
    %59 = vector.broadcast %cst_18 : f32 to vector<8x32xf32>
    %60 = arith.addf %59, %58 : vector<8x32xf32>
    %61 = arith.divf %59, %60 : vector<8x32xf32>
    %62 = vector.extract_strided_slice %44 {offsets = [0, 64], sizes = [8, 32], strides = [1, 1]} : vector<8x96xf32> to vector<8x32xf32>
    %63 = vector.extract_strided_slice %45 {offsets = [0, 64], sizes = [8, 32], strides = [1, 1]} : vector<8x96xf32> to vector<8x32xf32>
    %64 = vector.broadcast %4 : vector<1x32xf32> to vector<8x32xf32>
    %65 = arith.addf %63, %64 : vector<8x32xf32>
    %66 = arith.mulf %53, %65 : vector<8x32xf32>
    %67 = arith.addf %62, %66 : vector<8x32xf32>
    %68 = math.tanh %67 : vector<8x32xf32>
    %cst_19 = arith.constant 1.000000e+00 : f32
    %69 = vector.broadcast %cst_19 : f32 to vector<8x32xf32>
    %70 = arith.subf %69, %61 : vector<8x32xf32>
    %71 = arith.mulf %70, %68 : vector<8x32xf32>
    %72 = arith.mulf %61, %37 : vector<8x32xf32>
    %73 = arith.addf %71, %72 : vector<8x32xf32>
    %74 = arith.index_cast %c1_i32 : i32 to index
    %c0_20 = arith.constant 0 : index
    %c0_21 = arith.constant 0 : index
    %75 = vector.load %arg4[%74, %c0_20, %c0_21] : memref<8x8x32xf32, #tpu.memory_space<vmem>>, vector<1x8x32xf32>
    %76 = vector.shape_cast %75 : vector<1x8x32xf32> to vector<8x32xf32>
    %77 = vector.shape_cast %73 : vector<8x32xf32> to vector<1x8x32xf32>
    tpu.vector_store %arg4[%74, %c0_20, %c0_21], %77 {strides = array<i32>} : memref<8x8x32xf32, #tpu.memory_space<vmem>>, vector<1x8x32xf32>,
    %c2_i32 = arith.constant 2 : i32
    %78 = arith.index_cast %c2_i32 : i32 to index
    %c0_22 = arith.constant 0 : index
    %c0_23 = arith.constant 0 : index
    %79 = vector.load %arg1[%78, %c0_22, %c0_23] : memref<8x8x96xf32, #tpu.memory_space<vmem>>, vector<1x8x96xf32>
    %80 = vector.shape_cast %79 : vector<1x8x96xf32> to vector<8x96xf32>
    %cst_24 = arith.constant dense<0.000000e+00> : vector<8x96xf32>
    %81 = tpu.matmul %73, %3, %cst_24 {dimension_numbers = #tpu.dot_dimension_numbers<[1], [0], [0], [1], [0, 0, 1, 1], [], []>} : vector<8x32xf32>, vector<32x96xf32>, vector<8x96xf32> -> vector<8x96xf32>
    %82 = vector.extract_strided_slice %80 {offsets = [0, 0], sizes = [8, 32], strides = [1, 1]} : vector<8x96xf32> to vector<8x32xf32>
    %83 = vector.extract_strided_slice %81 {offsets = [0, 0], sizes = [8, 32], strides = [1, 1]} : vector<8x96xf32> to vector<8x32xf32>
    %84 = arith.addf %82, %83 : vector<8x32xf32>
    %85 = arith.negf %84 : vector<8x32xf32>
    %86 = math.exp %85 : vector<8x32xf32>
    %cst_25 = arith.constant 1.000000e+00 : f32
    %87 = vector.broadcast %cst_25 : f32 to vector<8x32xf32>
    %88 = arith.addf %87, %86 : vector<8x32xf32>
    %89 = arith.divf %87, %88 : vector<8x32xf32>
    %90 = vector.extract_strided_slice %80 {offsets = [0, 32], sizes = [8, 32], strides = [1, 1]} : vector<8x96xf32> to vector<8x32xf32>
    %91 = vector.extract_strided_slice %81 {offsets = [0, 32], sizes = [8, 32], strides = [1, 1]} : vector<8x96xf32> to vector<8x32xf32>
    %92 = arith.addf %90, %91 : vector<8x32xf32>
    %93 = arith.negf %92 : vector<8x32xf32>
    %94 = math.exp %93 : vector<8x32xf32>
    %cst_26 = arith.constant 1.000000e+00 : f32
    %95 = vector.broadcast %cst_26 : f32 to vector<8x32xf32>
    %96 = arith.addf %95, %94 : vector<8x32xf32>
    %97 = arith.divf %95, %96 : vector<8x32xf32>
    %98 = vector.extract_strided_slice %80 {offsets = [0, 64], sizes = [8, 32], strides = [1, 1]} : vector<8x96xf32> to vector<8x32xf32>
    %99 = vector.extract_strided_slice %81 {offsets = [0, 64], sizes = [8, 32], strides = [1, 1]} : vector<8x96xf32> to vector<8x32xf32>
    %100 = vector.broadcast %4 : vector<1x32xf32> to vector<8x32xf32>
    %101 = arith.addf %99, %100 : vector<8x32xf32>
    %102 = arith.mulf %89, %101 : vector<8x32xf32>
    %103 = arith.addf %98, %102 : vector<8x32xf32>
    %104 = math.tanh %103 : vector<8x32xf32>
    %cst_27 = arith.constant 1.000000e+00 : f32
    %105 = vector.broadcast %cst_27 : f32 to vector<8x32xf32>
    %106 = arith.subf %105, %97 : vector<8x32xf32>
    %107 = arith.mulf %106, %104 : vector<8x32xf32>
    %108 = arith.mulf %97, %73 : vector<8x32xf32>
    %109 = arith.addf %107, %108 : vector<8x32xf32>
    %110 = arith.index_cast %c2_i32 : i32 to index
    %c0_28 = arith.constant 0 : index
    %c0_29 = arith.constant 0 : index
    %111 = vector.load %arg4[%110, %c0_28, %c0_29] : memref<8x8x32xf32, #tpu.memory_space<vmem>>, vector<1x8x32xf32>
    %112 = vector.shape_cast %111 : vector<1x8x32xf32> to vector<8x32xf32>
    %113 = vector.shape_cast %109 : vector<8x32xf32> to vector<1x8x32xf32>
    tpu.vector_store %arg4[%110, %c0_28, %c0_29], %113 {strides = array<i32>} : memref<8x8x32xf32, #tpu.memory_space<vmem>>, vector<1x8x32xf32>,
    %c3_i32 = arith.constant 3 : i32
    %114 = arith.index_cast %c3_i32 : i32 to index
    %c0_30 = arith.constant 0 : index
    %c0_31 = arith.constant 0 : index
    %115 = vector.load %arg1[%114, %c0_30, %c0_31] : memref<8x8x96xf32, #tpu.memory_space<vmem>>, vector<1x8x96xf32>
    %116 = vector.shape_cast %115 : vector<1x8x96xf32> to vector<8x96xf32>
    %cst_32 = arith.constant dense<0.000000e+00> : vector<8x96xf32>
    %117 = tpu.matmul %109, %3, %cst_32 {dimension_numbers = #tpu.dot_dimension_numbers<[1], [0], [0], [1], [0, 0, 1, 1], [], []>} : vector<8x32xf32>, vector<32x96xf32>, vector<8x96xf32> -> vector<8x96xf32>
    %118 = vector.extract_strided_slice %116 {offsets = [0, 0], sizes = [8, 32], strides = [1, 1]} : vector<8x96xf32> to vector<8x32xf32>
    %119 = vector.extract_strided_slice %117 {offsets = [0, 0], sizes = [8, 32], strides = [1, 1]} : vector<8x96xf32> to vector<8x32xf32>
    %120 = arith.addf %118, %119 : vector<8x32xf32>
    %121 = arith.negf %120 : vector<8x32xf32>
    %122 = math.exp %121 : vector<8x32xf32>
    %cst_33 = arith.constant 1.000000e+00 : f32
    %123 = vector.broadcast %cst_33 : f32 to vector<8x32xf32>
    %124 = arith.addf %123, %122 : vector<8x32xf32>
    %125 = arith.divf %123, %124 : vector<8x32xf32>
    %126 = vector.extract_strided_slice %116 {offsets = [0, 32], sizes = [8, 32], strides = [1, 1]} : vector<8x96xf32> to vector<8x32xf32>
    %127 = vector.extract_strided_slice %117 {offsets = [0, 32], sizes = [8, 32], strides = [1, 1]} : vector<8x96xf32> to vector<8x32xf32>
    %128 = arith.addf %126, %127 : vector<8x32xf32>
    %129 = arith.negf %128 : vector<8x32xf32>
    %130 = math.exp %129 : vector<8x32xf32>
    %cst_34 = arith.constant 1.000000e+00 : f32
    %131 = vector.broadcast %cst_34 : f32 to vector<8x32xf32>
    %132 = arith.addf %131, %130 : vector<8x32xf32>
    %133 = arith.divf %131, %132 : vector<8x32xf32>
    %134 = vector.extract_strided_slice %116 {offsets = [0, 64], sizes = [8, 32], strides = [1, 1]} : vector<8x96xf32> to vector<8x32xf32>
    %135 = vector.extract_strided_slice %117 {offsets = [0, 64], sizes = [8, 32], strides = [1, 1]} : vector<8x96xf32> to vector<8x32xf32>
    %136 = vector.broadcast %4 : vector<1x32xf32> to vector<8x32xf32>
    %137 = arith.addf %135, %136 : vector<8x32xf32>
    %138 = arith.mulf %125, %137 : vector<8x32xf32>
    %139 = arith.addf %134, %138 : vector<8x32xf32>
    %140 = math.tanh %139 : vector<8x32xf32>
    %cst_35 = arith.constant 1.000000e+00 : f32
    %141 = vector.broadcast %cst_35 : f32 to vector<8x32xf32>
    %142 = arith.subf %141, %133 : vector<8x32xf32>
    %143 = arith.mulf %142, %140 : vector<8x32xf32>
    %144 = arith.mulf %133, %109 : vector<8x32xf32>
    %145 = arith.addf %143, %144 : vector<8x32xf32>
    %146 = arith.index_cast %c3_i32 : i32 to index
    %c0_36 = arith.constant 0 : index
    %c0_37 = arith.constant 0 : index
    %147 = vector.load %arg4[%146, %c0_36, %c0_37] : memref<8x8x32xf32, #tpu.memory_space<vmem>>, vector<1x8x32xf32>
    %148 = vector.shape_cast %147 : vector<1x8x32xf32> to vector<8x32xf32>
    %149 = vector.shape_cast %145 : vector<8x32xf32> to vector<1x8x32xf32>
    tpu.vector_store %arg4[%146, %c0_36, %c0_37], %149 {strides = array<i32>} : memref<8x8x32xf32, #tpu.memory_space<vmem>>, vector<1x8x32xf32>,
    %c4_i32 = arith.constant 4 : i32
    %150 = arith.index_cast %c4_i32 : i32 to index
    %c0_38 = arith.constant 0 : index
    %c0_39 = arith.constant 0 : index
    %151 = vector.load %arg1[%150, %c0_38, %c0_39] : memref<8x8x96xf32, #tpu.memory_space<vmem>>, vector<1x8x96xf32>
    %152 = vector.shape_cast %151 : vector<1x8x96xf32> to vector<8x96xf32>
    %cst_40 = arith.constant dense<0.000000e+00> : vector<8x96xf32>
    %153 = tpu.matmul %145, %3, %cst_40 {dimension_numbers = #tpu.dot_dimension_numbers<[1], [0], [0], [1], [0, 0, 1, 1], [], []>} : vector<8x32xf32>, vector<32x96xf32>, vector<8x96xf32> -> vector<8x96xf32>
    %154 = vector.extract_strided_slice %152 {offsets = [0, 0], sizes = [8, 32], strides = [1, 1]} : vector<8x96xf32> to vector<8x32xf32>
    %155 = vector.extract_strided_slice %153 {offsets = [0, 0], sizes = [8, 32], strides = [1, 1]} : vector<8x96xf32> to vector<8x32xf32>
    %156 = arith.addf %154, %155 : vector<8x32xf32>
    %157 = arith.negf %156 : vector<8x32xf32>
    %158 = math.exp %157 : vector<8x32xf32>
    %cst_41 = arith.constant 1.000000e+00 : f32
    %159 = vector.broadcast %cst_41 : f32 to vector<8x32xf32>
    %160 = arith.addf %159, %158 : vector<8x32xf32>
    %161 = arith.divf %159, %160 : vector<8x32xf32>
    %162 = vector.extract_strided_slice %152 {offsets = [0, 32], sizes = [8, 32], strides = [1, 1]} : vector<8x96xf32> to vector<8x32xf32>
    %163 = vector.extract_strided_slice %153 {offsets = [0, 32], sizes = [8, 32], strides = [1, 1]} : vector<8x96xf32> to vector<8x32xf32>
    %164 = arith.addf %162, %163 : vector<8x32xf32>
    %165 = arith.negf %164 : vector<8x32xf32>
    %166 = math.exp %165 : vector<8x32xf32>
    %cst_42 = arith.constant 1.000000e+00 : f32
    %167 = vector.broadcast %cst_42 : f32 to vector<8x32xf32>
    %168 = arith.addf %167, %166 : vector<8x32xf32>
    %169 = arith.divf %167, %168 : vector<8x32xf32>
    %170 = vector.extract_strided_slice %152 {offsets = [0, 64], sizes = [8, 32], strides = [1, 1]} : vector<8x96xf32> to vector<8x32xf32>
    %171 = vector.extract_strided_slice %153 {offsets = [0, 64], sizes = [8, 32], strides = [1, 1]} : vector<8x96xf32> to vector<8x32xf32>
    %172 = vector.broadcast %4 : vector<1x32xf32> to vector<8x32xf32>
    %173 = arith.addf %171, %172 : vector<8x32xf32>
    %174 = arith.mulf %161, %173 : vector<8x32xf32>
    %175 = arith.addf %170, %174 : vector<8x32xf32>
    %176 = math.tanh %175 : vector<8x32xf32>
    %cst_43 = arith.constant 1.000000e+00 : f32
    %177 = vector.broadcast %cst_43 : f32 to vector<8x32xf32>
    %178 = arith.subf %177, %169 : vector<8x32xf32>
    %179 = arith.mulf %178, %176 : vector<8x32xf32>
    %180 = arith.mulf %169, %145 : vector<8x32xf32>
    %181 = arith.addf %179, %180 : vector<8x32xf32>
    %182 = arith.index_cast %c4_i32 : i32 to index
    %c0_44 = arith.constant 0 : index
    %c0_45 = arith.constant 0 : index
    %183 = vector.load %arg4[%182, %c0_44, %c0_45] : memref<8x8x32xf32, #tpu.memory_space<vmem>>, vector<1x8x32xf32>
    %184 = vector.shape_cast %183 : vector<1x8x32xf32> to vector<8x32xf32>
    %185 = vector.shape_cast %181 : vector<8x32xf32> to vector<1x8x32xf32>
    tpu.vector_store %arg4[%182, %c0_44, %c0_45], %185 {strides = array<i32>} : memref<8x8x32xf32, #tpu.memory_space<vmem>>, vector<1x8x32xf32>,
    %c5_i32 = arith.constant 5 : i32
    %186 = arith.index_cast %c5_i32 : i32 to index
    %c0_46 = arith.constant 0 : index
    %c0_47 = arith.constant 0 : index
    %187 = vector.load %arg1[%186, %c0_46, %c0_47] : memref<8x8x96xf32, #tpu.memory_space<vmem>>, vector<1x8x96xf32>
    %188 = vector.shape_cast %187 : vector<1x8x96xf32> to vector<8x96xf32>
    %cst_48 = arith.constant dense<0.000000e+00> : vector<8x96xf32>
    %189 = tpu.matmul %181, %3, %cst_48 {dimension_numbers = #tpu.dot_dimension_numbers<[1], [0], [0], [1], [0, 0, 1, 1], [], []>} : vector<8x32xf32>, vector<32x96xf32>, vector<8x96xf32> -> vector<8x96xf32>
    %190 = vector.extract_strided_slice %188 {offsets = [0, 0], sizes = [8, 32], strides = [1, 1]} : vector<8x96xf32> to vector<8x32xf32>
    %191 = vector.extract_strided_slice %189 {offsets = [0, 0], sizes = [8, 32], strides = [1, 1]} : vector<8x96xf32> to vector<8x32xf32>
    %192 = arith.addf %190, %191 : vector<8x32xf32>
    %193 = arith.negf %192 : vector<8x32xf32>
    %194 = math.exp %193 : vector<8x32xf32>
    %cst_49 = arith.constant 1.000000e+00 : f32
    %195 = vector.broadcast %cst_49 : f32 to vector<8x32xf32>
    %196 = arith.addf %195, %194 : vector<8x32xf32>
    %197 = arith.divf %195, %196 : vector<8x32xf32>
    %198 = vector.extract_strided_slice %188 {offsets = [0, 32], sizes = [8, 32], strides = [1, 1]} : vector<8x96xf32> to vector<8x32xf32>
    %199 = vector.extract_strided_slice %189 {offsets = [0, 32], sizes = [8, 32], strides = [1, 1]} : vector<8x96xf32> to vector<8x32xf32>
    %200 = arith.addf %198, %199 : vector<8x32xf32>
    %201 = arith.negf %200 : vector<8x32xf32>
    %202 = math.exp %201 : vector<8x32xf32>
    %cst_50 = arith.constant 1.000000e+00 : f32
    %203 = vector.broadcast %cst_50 : f32 to vector<8x32xf32>
    %204 = arith.addf %203, %202 : vector<8x32xf32>
    %205 = arith.divf %203, %204 : vector<8x32xf32>
    %206 = vector.extract_strided_slice %188 {offsets = [0, 64], sizes = [8, 32], strides = [1, 1]} : vector<8x96xf32> to vector<8x32xf32>
    %207 = vector.extract_strided_slice %189 {offsets = [0, 64], sizes = [8, 32], strides = [1, 1]} : vector<8x96xf32> to vector<8x32xf32>
    %208 = vector.broadcast %4 : vector<1x32xf32> to vector<8x32xf32>
    %209 = arith.addf %207, %208 : vector<8x32xf32>
    %210 = arith.mulf %197, %209 : vector<8x32xf32>
    %211 = arith.addf %206, %210 : vector<8x32xf32>
    %212 = math.tanh %211 : vector<8x32xf32>
    %cst_51 = arith.constant 1.000000e+00 : f32
    %213 = vector.broadcast %cst_51 : f32 to vector<8x32xf32>
    %214 = arith.subf %213, %205 : vector<8x32xf32>
    %215 = arith.mulf %214, %212 : vector<8x32xf32>
    %216 = arith.mulf %205, %181 : vector<8x32xf32>
    %217 = arith.addf %215, %216 : vector<8x32xf32>
    %218 = arith.index_cast %c5_i32 : i32 to index
    %c0_52 = arith.constant 0 : index
    %c0_53 = arith.constant 0 : index
    %219 = vector.load %arg4[%218, %c0_52, %c0_53] : memref<8x8x32xf32, #tpu.memory_space<vmem>>, vector<1x8x32xf32>
    %220 = vector.shape_cast %219 : vector<1x8x32xf32> to vector<8x32xf32>
    %221 = vector.shape_cast %217 : vector<8x32xf32> to vector<1x8x32xf32>
    tpu.vector_store %arg4[%218, %c0_52, %c0_53], %221 {strides = array<i32>} : memref<8x8x32xf32, #tpu.memory_space<vmem>>, vector<1x8x32xf32>,
    %c6_i32 = arith.constant 6 : i32
    %222 = arith.index_cast %c6_i32 : i32 to index
    %c0_54 = arith.constant 0 : index
    %c0_55 = arith.constant 0 : index
    %223 = vector.load %arg1[%222, %c0_54, %c0_55] : memref<8x8x96xf32, #tpu.memory_space<vmem>>, vector<1x8x96xf32>
    %224 = vector.shape_cast %223 : vector<1x8x96xf32> to vector<8x96xf32>
    %cst_56 = arith.constant dense<0.000000e+00> : vector<8x96xf32>
    %225 = tpu.matmul %217, %3, %cst_56 {dimension_numbers = #tpu.dot_dimension_numbers<[1], [0], [0], [1], [0, 0, 1, 1], [], []>} : vector<8x32xf32>, vector<32x96xf32>, vector<8x96xf32> -> vector<8x96xf32>
    %226 = vector.extract_strided_slice %224 {offsets = [0, 0], sizes = [8, 32], strides = [1, 1]} : vector<8x96xf32> to vector<8x32xf32>
    %227 = vector.extract_strided_slice %225 {offsets = [0, 0], sizes = [8, 32], strides = [1, 1]} : vector<8x96xf32> to vector<8x32xf32>
    %228 = arith.addf %226, %227 : vector<8x32xf32>
    %229 = arith.negf %228 : vector<8x32xf32>
    %230 = math.exp %229 : vector<8x32xf32>
    %cst_57 = arith.constant 1.000000e+00 : f32
    %231 = vector.broadcast %cst_57 : f32 to vector<8x32xf32>
    %232 = arith.addf %231, %230 : vector<8x32xf32>
    %233 = arith.divf %231, %232 : vector<8x32xf32>
    %234 = vector.extract_strided_slice %224 {offsets = [0, 32], sizes = [8, 32], strides = [1, 1]} : vector<8x96xf32> to vector<8x32xf32>
    %235 = vector.extract_strided_slice %225 {offsets = [0, 32], sizes = [8, 32], strides = [1, 1]} : vector<8x96xf32> to vector<8x32xf32>
    %236 = arith.addf %234, %235 : vector<8x32xf32>
    %237 = arith.negf %236 : vector<8x32xf32>
    %238 = math.exp %237 : vector<8x32xf32>
    %cst_58 = arith.constant 1.000000e+00 : f32
    %239 = vector.broadcast %cst_58 : f32 to vector<8x32xf32>
    %240 = arith.addf %239, %238 : vector<8x32xf32>
    %241 = arith.divf %239, %240 : vector<8x32xf32>
    %242 = vector.extract_strided_slice %224 {offsets = [0, 64], sizes = [8, 32], strides = [1, 1]} : vector<8x96xf32> to vector<8x32xf32>
    %243 = vector.extract_strided_slice %225 {offsets = [0, 64], sizes = [8, 32], strides = [1, 1]} : vector<8x96xf32> to vector<8x32xf32>
    %244 = vector.broadcast %4 : vector<1x32xf32> to vector<8x32xf32>
    %245 = arith.addf %243, %244 : vector<8x32xf32>
    %246 = arith.mulf %233, %245 : vector<8x32xf32>
    %247 = arith.addf %242, %246 : vector<8x32xf32>
    %248 = math.tanh %247 : vector<8x32xf32>
    %cst_59 = arith.constant 1.000000e+00 : f32
    %249 = vector.broadcast %cst_59 : f32 to vector<8x32xf32>
    %250 = arith.subf %249, %241 : vector<8x32xf32>
    %251 = arith.mulf %250, %248 : vector<8x32xf32>
    %252 = arith.mulf %241, %217 : vector<8x32xf32>
    %253 = arith.addf %251, %252 : vector<8x32xf32>
    %254 = arith.index_cast %c6_i32 : i32 to index
    %c0_60 = arith.constant 0 : index
    %c0_61 = arith.constant 0 : index
    %255 = vector.load %arg4[%254, %c0_60, %c0_61] : memref<8x8x32xf32, #tpu.memory_space<vmem>>, vector<1x8x32xf32>
    %256 = vector.shape_cast %255 : vector<1x8x32xf32> to vector<8x32xf32>
    %257 = vector.shape_cast %253 : vector<8x32xf32> to vector<1x8x32xf32>
    tpu.vector_store %arg4[%254, %c0_60, %c0_61], %257 {strides = array<i32>} : memref<8x8x32xf32, #tpu.memory_space<vmem>>, vector<1x8x32xf32>,
    %c7_i32 = arith.constant 7 : i32
    %258 = arith.index_cast %c7_i32 : i32 to index
    %c0_62 = arith.constant 0 : index
    %c0_63 = arith.constant 0 : index
    %259 = vector.load %arg1[%258, %c0_62, %c0_63] : memref<8x8x96xf32, #tpu.memory_space<vmem>>, vector<1x8x96xf32>
    %260 = vector.shape_cast %259 : vector<1x8x96xf32> to vector<8x96xf32>
    %cst_64 = arith.constant dense<0.000000e+00> : vector<8x96xf32>
    %261 = tpu.matmul %253, %3, %cst_64 {dimension_numbers = #tpu.dot_dimension_numbers<[1], [0], [0], [1], [0, 0, 1, 1], [], []>} : vector<8x32xf32>, vector<32x96xf32>, vector<8x96xf32> -> vector<8x96xf32>
    %262 = vector.extract_strided_slice %260 {offsets = [0, 0], sizes = [8, 32], strides = [1, 1]} : vector<8x96xf32> to vector<8x32xf32>
    %263 = vector.extract_strided_slice %261 {offsets = [0, 0], sizes = [8, 32], strides = [1, 1]} : vector<8x96xf32> to vector<8x32xf32>
    %264 = arith.addf %262, %263 : vector<8x32xf32>
    %265 = arith.negf %264 : vector<8x32xf32>
    %266 = math.exp %265 : vector<8x32xf32>
    %cst_65 = arith.constant 1.000000e+00 : f32
    %267 = vector.broadcast %cst_65 : f32 to vector<8x32xf32>
    %268 = arith.addf %267, %266 : vector<8x32xf32>
    %269 = arith.divf %267, %268 : vector<8x32xf32>
    %270 = vector.extract_strided_slice %260 {offsets = [0, 32], sizes = [8, 32], strides = [1, 1]} : vector<8x96xf32> to vector<8x32xf32>
    %271 = vector.extract_strided_slice %261 {offsets = [0, 32], sizes = [8, 32], strides = [1, 1]} : vector<8x96xf32> to vector<8x32xf32>
    %272 = arith.addf %270, %271 : vector<8x32xf32>
    %273 = arith.negf %272 : vector<8x32xf32>
    %274 = math.exp %273 : vector<8x32xf32>
    %cst_66 = arith.constant 1.000000e+00 : f32
    %275 = vector.broadcast %cst_66 : f32 to vector<8x32xf32>
    %276 = arith.addf %275, %274 : vector<8x32xf32>
    %277 = arith.divf %275, %276 : vector<8x32xf32>
    %278 = vector.extract_strided_slice %260 {offsets = [0, 64], sizes = [8, 32], strides = [1, 1]} : vector<8x96xf32> to vector<8x32xf32>
    %279 = vector.extract_strided_slice %261 {offsets = [0, 64], sizes = [8, 32], strides = [1, 1]} : vector<8x96xf32> to vector<8x32xf32>
    %280 = vector.broadcast %4 : vector<1x32xf32> to vector<8x32xf32>
    %281 = arith.addf %279, %280 : vector<8x32xf32>
    %282 = arith.mulf %269, %281 : vector<8x32xf32>
    %283 = arith.addf %278, %282 : vector<8x32xf32>
    %284 = math.tanh %283 : vector<8x32xf32>
    %cst_67 = arith.constant 1.000000e+00 : f32
    %285 = vector.broadcast %cst_67 : f32 to vector<8x32xf32>
    %286 = arith.subf %285, %277 : vector<8x32xf32>
    %287 = arith.mulf %286, %284 : vector<8x32xf32>
    %288 = arith.mulf %277, %253 : vector<8x32xf32>
    %289 = arith.addf %287, %288 : vector<8x32xf32>
    %290 = arith.index_cast %c7_i32 : i32 to index
    %c0_68 = arith.constant 0 : index
    %c0_69 = arith.constant 0 : index
    %291 = vector.load %arg4[%290, %c0_68, %c0_69] : memref<8x8x32xf32, #tpu.memory_space<vmem>>, vector<1x8x32xf32>
    %292 = vector.shape_cast %291 : vector<1x8x32xf32> to vector<8x32xf32>
    %293 = vector.shape_cast %289 : vector<8x32xf32> to vector<1x8x32xf32>
    tpu.vector_store %arg4[%290, %c0_68, %c0_69], %293 {strides = array<i32>} : memref<8x8x32xf32, #tpu.memory_space<vmem>>, vector<1x8x32xf32>,
    %c8_i32 = arith.constant 8 : i32
    %c0_70 = arith.constant 0 : index
    %c0_71 = arith.constant 0 : index
    %294 = vector.load %arg5[%c0_70, %c0_71] : memref<8x32xf32, #tpu.memory_space<vmem>>, vector<8x32xf32>
    tpu.vector_store %arg5[%c0_70, %c0_71], %289 {strides = array<i32>} : memref<8x32xf32, #tpu.memory_space<vmem>>, vector<8x32xf32>,
    return
  }
  func.func @transform_0(%arg0: i32) -> (i32, i32, i32) {
    %c0_i32 = arith.constant 0 : i32
    %c0_i32_0 = arith.constant 0 : i32
    %c0_i32_1 = arith.constant 0 : i32
    return %arg0, %c0_i32, %c0_i32_0 : i32, i32, i32
  }
  func.func @transform_1(%arg0: i32) -> (i32, i32) {
    %c0_i32 = arith.constant 0 : i32
    %c0_i32_0 = arith.constant 0 : i32
    %c0_i32_1 = arith.constant 0 : i32
    return %c0_i32, %c0_i32_0 : i32, i32
  }
  func.func @transform_2(%arg0: i32) -> (i32, i32) {
    %c0_i32 = arith.constant 0 : i32
    %c0_i32_0 = arith.constant 0 : i32
    %c0_i32_1 = arith.constant 0 : i32
    return %c0_i32, %c0_i32_0 : i32, i32
  }
  func.func @transform_3(%arg0: i32) -> (i32, i32, i32) {
    %c0_i32 = arith.constant 0 : i32
    %c0_i32_0 = arith.constant 0 : i32
    %c0_i32_1 = arith.constant 0 : i32
    return %arg0, %c0_i32, %c0_i32_0 : i32, i32, i32
  }
}

</mosaic_0001>

<bundles_post_ra>
// kernel: tpu_custom_call.1
= control target key start
LH: loop header
LB: loop body
LE: loop exit
PB: predicated region body
PF: predicated region fallthrough
CT: control target
= control target key end

     0   :  { %8 = vsyncpa [#allocation4], 0  ;;  %s1458_s0 = inlined_call_operand.hbm [shape: f32[8,8,96], index: 0, kind: input, shape index: {}]   ;;  %s1459_s1 = inlined_call_operand.hbm [shape: f32[32,96], index: 1, kind: input, shape index: {}]   ;;  %s1460_s2 = inlined_call_operand.vmem [shape: f32[1,32], index: 2, kind: input, shape index: {}]   ;;  %s1461_s3 = inlined_call_operand.hbm [shape: f32[8,8,32], index: 3, kind: output, shape index: {}]  }
   0x1   :  { %9 = vsyncpa [#allocation7], 0 }
   0x2   :  { %10 = vsyncpa [#allocation5], 0  ;;  %s1265_s12 = smov [#allocation3]   ;;  %s1193_s16 = scalar_lea.hbm %s1458_s0, 1024 }
   0x3   :  { %s16_s13 = sshll.u32 %s1265_s12, 4  ;;  %p1194_p0 = scmp.ne.s32.totalorder %s1458_s0, %s1193_s16  ;;  %s17_s13 = int_to_ptr.vmem [resolvable:$true] %s16_s13 }
   0x4   :  { %p1197_p1 = scmp.lt.u32.totalorder %s1193_s16, %s1458_s0 }
   0x6   :  { %p1199_p2 = pnand %p1197_p1, %p1194_p0 }
   0x8   :  { %1202 = shalt.err (!%p1199_p2)
}
   0x9   :  { %s1203_s21 = scalar_lea.vmem %s17_s13, 1024  ;;  %p1208_p4 = scmp.lt.s32.totalorder %s17_s13, %s17_s13 }
   0xa   :  { %p1204_p3 = scmp.ne.s32.totalorder %s17_s13, %s1203_s21  ;;  %p1209_p5 = scmp.lt.s32.totalorder %s1203_s21, %s1203_s21 }
   0xc   :  { %p1210_p6 = por %p1209_p5, %p1208_p4 }
   0xe   :  { %p1211_p7 = pnand %p1210_p6, %p1204_p3 }
  0x10   :  { %1214 = shalt.err (!%p1211_p7)
}
  0x11   :  { %s1266_s22 = smov 128   ;;  %s1267_s23 = smov 8  }
  0x12   :  { %22 = dma.hbm_to_vmem [thread:$0]  %s1458_s0, 1024, %s17_s13, [#allocation4], %s1266_s22, %s1266_s22, %s1267_s23  }
  0x13   :  { %s1268_s26 = smov [#allocation6]   ;;  %s1215_s30 = scalar_lea.hbm %s1459_s1, 512 }
  0x14   :  { %s28_s27 = sshll.u32 %s1268_s26, 4  ;;  %p1216_p8 = scmp.ne.s32.totalorder %s1459_s1, %s1215_s30  ;;  %s29_s27 = int_to_ptr.vmem [resolvable:$true] %s28_s27 }
  0x15   :  { %p1219_p9 = scmp.lt.u32.totalorder %s1215_s30, %s1459_s1 }
  0x17   :  { %p1221_p10 = pnand %p1219_p9, %p1216_p8 }
  0x19   :  { %1224 = shalt.err (!%p1221_p10)
}
  0x1a   :  { %s1225_s8 = scalar_lea.vmem %s29_s27, 512  ;;  %p1230_p12 = scmp.lt.s32.totalorder %s29_s27, %s29_s27 }
  0x1b   :  { %p1226_p11 = scmp.ne.s32.totalorder %s29_s27, %s1225_s8  ;;  %p1231_p13 = scmp.lt.s32.totalorder %s1225_s8, %s1225_s8 }
  0x1d   :  { %p1232_p0 = por %p1231_p13, %p1230_p12 }
  0x1f   :  { %p1233_p1 = pnand %p1232_p0, %p1226_p11 }
  0x21   :  { %1236 = shalt.err (!%p1233_p1)
}
  0x22   :  { %34 = dma.hbm_to_vmem [thread:$0]  %s1459_s1, 512, %s29_s27, [#allocation7], %s1266_s22, %s1266_s22, %s1267_s23  }
  0x23   :  { %1259 = dma.done.wait [#allocation4], 1024  }
  0x24   :  { %1260 = vsyncadd [#allocation4], 4294966272 }
  0x25   :  { %1261 = dma.done.wait [#allocation7], 512  }
  0x26   :  { %1262 = vsyncadd [#allocation7], 4294966784  ;;  %vm47_vm0 = vcmask 261120   ;;  %v1269_v0 = vmov 0.0|0.0   ;;  %vm1270_vm1 = vmmov 0   ;;  %v1271_v1 = vmov 0.0  }
  0x27   :  { %1086 = vmatprep.subr.bf16.mxu0 %v1269_v0  ;;  %1006 = vmatprep.mubr.msk.f32.mxu0 %vm1270_vm1, %v1271_v1  ;;  %48 = vst.msk [vmem:[#allocation2] sm:$0xff] %vm47_vm0, %v1271_v1  ;;  %v49_v2 = vld [vmem:[#allocation6] sm:$0xff]  ;;  %v50_v3 = vld [vmem:[#allocation6 + $0x8] sm:$0xff]  ;;  %v51_v4 = vld [vmem:[#allocation6 + $0x10] sm:$0xff]  ;;  %s1272_s11 = smov 64   ;;  %s1274_s12 = smov 96  }
  0x28   :  { %1092 = vmatprep.subr.bf16.mxu1 %v1269_v0  ;;  %1017 = vmatprep.mubr.msk.f32.mxu1 %vm1270_vm1, %v1271_v1  ;;  %v1334_v5 = vpack.c.bf16 %v50_v3, %v49_v2  ;;  %v52_v6 = vld [vmem:[#allocation6 + $0x18] sm:$0xff]  ;;  %v55_v14 = vld [vmem:[#allocation3] sm:$0xff]  ;;  %v174_v35 = vld [vmem:[#allocation3 + $0x8] sm:$0xff]  ;;  %s1275_s13 = smov [#allocation8]  }
  0x29   :  { %v943_v7 = vld [vmem:[%s1460_s2] ss:$0 sm:$0xff]  ;;  %v1341_v8 = vpack.c.bf16 %v52_v6, %v51_v4  ;;  %s1273_s2 = smov 32   ;;  %v281_v55 = vld [vmem:[#allocation3 + $0x10] sm:$0xff]  ;;  %s928_s14 = sshll.u32 %s1275_s13, 4  ;;  %s929_s14 = int_to_ptr.vmem [resolvable:$true] %s928_s14 }
  0x2a   :  { %142 = vrot.lane.b32.xlu0 %v943_v7, %s1272_s11  ;;  %1088 = vmatpush3.bf16.msra.mxu0 %v1334_v5  ;;  %s1237_s15 = scalar_lea.vmem %s929_s14, 1024  ;;  %p1242_p3 = scmp.lt.s32.totalorder %s929_s14, %s929_s14 }
  0x2b   :  { %1094 = vmatpush3.bf16.msra.mxu1 %v1334_v5  ;;  %1089 = vmatprep.subr.bf16.mxu0 %v1269_v0  ;;  %p1238_p2 = scmp.ne.s32.totalorder %s929_s14, %s1237_s15  ;;  %p1243_p4 = scmp.lt.s32.totalorder %s1237_s15, %s1237_s15 }
  0x2c   :  { %1095 = vmatprep.subr.bf16.mxu1 %v1269_v0 }
  0x2d   :  { %p1244_p5 = por %p1243_p4, %p1242_p3 }
  0x2e   :  { %1091 = vmatpush3.bf16.msra.mxu0 %v1341_v8  ;;  %v54_v9 = vld [vmem:[#allocation2] sm:$0xff] }
  0x2f   :  { %1097 = vmatpush3.bf16.msra.mxu1 %v1341_v8  ;;  %1098 = vmatprep.subr.bf16.mxu0 %v1269_v0  ;;  %p1245_p6 = pnand %p1244_p5, %p1238_p2 }
  0x30   :  { %1104 = vmatprep.subr.bf16.mxu1 %v1269_v0 }
  0x31   :  { %1007 = vmatmul.mubr.msk.f32.vlgmr.msra.gmra.mrb[0].mxu0 %vm47_vm0, %v54_v9 }
  0x32   :  { %1100 = vmatpush3.bf16.msra.mxu0 %v1334_v5  ;;  %1028 = vmatprep.mubr.msk.f32.mxu0 %vm1270_vm1, %v1271_v1 }
  0x33   :  { %1101 = vmatprep.subr.bf16.mxu0 %v1269_v0 }
  0x36   :  { %1103 = vmatpush3.bf16.msra.mxu0 %v1341_v8 }
  0x37   :  { %1110 = vmatprep.subr.bf16.mxu0 %v1269_v0 }
  0x9c   :  { %v1357_v10 = vpop.permute.xlu0 %142 }
 0x104   :  { %v126_v11 = vpop.f32.mrb[0].mxu0 }
 0x105   :  { %v145_v12 = vadd.f32 %v1357_v10, %v126_v11  ;;  %v1008_v13 = vpop.f32.mrb[1].mxu0  ;;  %v130_v15 = vadd.f32 %v126_v11, %v55_v14 }
 0x107   :  { %147 = vrot.lane.b32.xlu0 %v145_v12, %s1272_s11  ;;  %v942_v16 = vmul.f32 -1.442695, %v130_v15 }
 0x109   :  { %1145 = vpow2.f32 %v942_v16  ;;  %v388_v16 = vld [vmem:[#allocation3 + $0x18] sm:$0xff] }
 0x10b   :  { %163 = vrot.lane.b32.xlu0 %v54_v9, %s1273_s2 }
 0x113   :  { %v1146_v17 = vpop.eup %1145 }
 0x114   :  { %v134_v18 = vadd.f32 1.0, %v1146_v17 }
 0x116   :  { %1147 = vrcp.f32 %v134_v18 }
 0x120   :  { %v1148_v19 = vpop.eup %1147 }
 0x121   :  { %v157_v26 = vsub.f32 1.0, %v1148_v19 }
 0x179   :  { %v148_v20 = vpop.permute.xlu0 %147 }
 0x17a   :  { %v150_v21 = vmul.f32 %v1148_v19, %v148_v20 }
 0x17c   :  { %152 = vrot.lane.b32.xlu1 %v150_v21, %s1272_s11 }
 0x17d   :  { %v164_v25 = vpop.permute.xlu0 %163 }
 0x17e   :  { %v166_v28 = vmul.f32 %v1148_v19, %v164_v25 }
 0x1ee   :  { %v153_v22 = vpop.permute.xlu1 %152 }
 0x1ef   :  { %v155_v23 = vadd.f32 %v153_v22, %v55_v14 }
 0x1f1   :  { %1149 = vtanh.f32 %v155_v23 }
 0x1fb   :  { %v1150_v24 = vpop.eup %1149 }
 0x1fc   :  { %159 = vrot.lane.b32.xlu1 %v1150_v24, %s1274_s12 }
 0x26e   :  { %v160_v27 = vpop.permute.xlu1 %159 }
 0x26f   :  { %v162_v29 = vmul.f32 %v160_v27, %v157_v26 }
 0x271   :  { %v167_v30 = vadd.f32 %v166_v28, %v162_v29 }
 0x273   :  { %169 = vrot.lane.b32.xlu1 %v167_v30, %s1274_s12 }
 0x2e5   :  { %v170_v31 = vpop.permute.xlu1 %169 }
 0x2e6   :  { %172 = vst.msk [vmem:[#allocation8] sm:$0xff] %vm47_vm0, %v170_v31  ;;  %1018 = vmatmul.mubr.msk.f32.vlgmr.msra.gmra.mrb[0].mxu1 %vm47_vm0, %v170_v31 }
 0x2e7   :  { %1106 = vmatpush3.bf16.msra.mxu1 %v1334_v5  ;;  %1039 = vmatprep.mubr.msk.f32.mxu1 %vm1270_vm1, %v1271_v1 }
 0x2e8   :  { %1107 = vmatprep.subr.bf16.mxu1 %v1269_v0 }
 0x2eb   :  { %1109 = vmatpush3.bf16.msra.mxu1 %v1341_v8 }
 0x2ec   :  { %1116 = vmatprep.subr.bf16.mxu1 %v1269_v0 }
 0x3b9   :  { %v243_v32 = vpop.f32.mrb[0].mxu1 }
 0x3ba   :  { %v254_v33 = vadd.f32 %v243_v32, %v1357_v10  ;;  %v1019_v34 = vpop.f32.mrb[1].mxu1  ;;  %v247_v36 = vadd.f32 %v243_v32, %v174_v35 }
 0x3bc   :  { %256 = vrot.lane.b32.xlu0 %v254_v33, %s1272_s11  ;;  %v945_v37 = vmul.f32 -1.442695, %v247_v36  ;;  %v495_v36 = vld [vmem:[#allocation3 + $0x20] sm:$0xff] }
 0x3be   :  { %1151 = vpow2.f32 %v945_v37 }
 0x3c8   :  { %v1152_v38 = vpop.eup %1151 }
 0x3c9   :  { %v251_v39 = vadd.f32 1.0, %v1152_v38 }
 0x3cb   :  { %1153 = vrcp.f32 %v251_v39 }
 0x3d5   :  { %v1154_v40 = vpop.eup %1153 }
 0x3d6   :  { %v266_v46 = vsub.f32 1.0, %v1154_v40  ;;  %v272_v48 = vmul.f32 %v1154_v40, %v167_v30 }
 0x42e   :  { %v257_v41 = vpop.permute.xlu0 %256 }
 0x42f   :  { %v259_v42 = vmul.f32 %v1154_v40, %v257_v41 }
 0x431   :  { %261 = vrot.lane.b32.xlu1 %v259_v42, %s1272_s11 }
 0x4a3   :  { %v262_v43 = vpop.permute.xlu1 %261 }
 0x4a4   :  { %v264_v44 = vadd.f32 %v262_v43, %v174_v35 }
 0x4a6   :  { %1155 = vtanh.f32 %v264_v44 }
 0x4b0   :  { %v1156_v45 = vpop.eup %1155 }
 0x4b1   :  { %268 = vrot.lane.b32.xlu0 %v1156_v45, %s1274_s12 }
 0x523   :  { %v269_v47 = vpop.permute.xlu0 %268 }
 0x524   :  { %v271_v49 = vmul.f32 %v269_v47, %v266_v46 }
 0x526   :  { %v273_v50 = vadd.f32 %v272_v48, %v271_v49 }
 0x528   :  { %275 = vrot.lane.b32.xlu1 %v273_v50, %s1274_s12 }
 0x59a   :  { %v276_v51 = vpop.permute.xlu1 %275 }
 0x59b   :  { %279 = vst.msk [vmem:[#allocation8 + $0x8] sm:$0xff] %vm47_vm0, %v276_v51  ;;  %1029 = vmatmul.mubr.msk.f32.vlgmr.msra.gmra.mrb[2].mxu0 %vm47_vm0, %v276_v51 }
 0x59c   :  { %1112 = vmatpush3.bf16.msra.mxu0 %v1334_v5  ;;  %1050 = vmatprep.mubr.msk.f32.mxu0 %vm1270_vm1, %v1271_v1 }
 0x59d   :  { %1113 = vmatprep.subr.bf16.mxu0 %v1269_v0 }
 0x5a0   :  { %1115 = vmatpush3.bf16.msra.mxu0 %v1341_v8 }
 0x5a1   :  { %1122 = vmatprep.subr.bf16.mxu0 %v1269_v0 }
 0x66e   :  { %v350_v52 = vpop.f32.mrb[2].mxu0 }
 0x66f   :  { %v361_v53 = vadd.f32 %v350_v52, %v1357_v10  ;;  %v1030_v54 = vpop.f32.mrb[3].mxu0  ;;  %v354_v56 = vadd.f32 %v350_v52, %v281_v55 }
 0x671   :  { %363 = vrot.lane.b32.xlu0 %v361_v53, %s1272_s11  ;;  %v947_v57 = vmul.f32 -1.442695, %v354_v56  ;;  %v602_v56 = vld [vmem:[#allocation3 + $0x28] sm:$0xff] }
 0x673   :  { %1157 = vpow2.f32 %v947_v57 }
 0x67d   :  { %v1158_v58 = vpop.eup %1157 }
 0x67e   :  { %v358_v59 = vadd.f32 1.0, %v1158_v58 }
 0x680   :  { %1159 = vrcp.f32 %v358_v59 }
 0x68a   :  { %v1160_v60 = vpop.eup %1159 }
 0x68b   :  { %v373_v4 = vsub.f32 1.0, %v1160_v60  ;;  %v379_v7 = vmul.f32 %v1160_v60, %v273_v50 }
 0x6e3   :  { %v364_v61 = vpop.permute.xlu0 %363 }
 0x6e4   :  { %v366_v62 = vmul.f32 %v1160_v60, %v364_v61 }
 0x6e6   :  { %368 = vrot.lane.b32.xlu1 %v366_v62, %s1272_s11 }
 0x758   :  { %v369_v63 = vpop.permute.xlu1 %368 }
 0x759   :  { %v371_v2 = vadd.f32 %v369_v63, %v281_v55 }
 0x75b   :  { %1161 = vtanh.f32 %v371_v2 }
 0x765   :  { %v1162_v3 = vpop.eup %1161 }
 0x766   :  { %375 = vrot.lane.b32.xlu0 %v1162_v3, %s1274_s12 }
 0x7d8   :  { %v376_v6 = vpop.permute.xlu0 %375 }
 0x7d9   :  { %v378_v9 = vmul.f32 %v376_v6, %v373_v4 }
 0x7db   :  { %v380_v11 = vadd.f32 %v379_v7, %v378_v9 }
 0x7dd   :  { %382 = vrot.lane.b32.xlu1 %v380_v11, %s1274_s12 }
 0x84f   :  { %v383_v12 = vpop.permute.xlu1 %382 }
 0x850   :  { %386 = vst.msk [vmem:[#allocation8 + $0x10] sm:$0xff] %vm47_vm0, %v383_v12  ;;  %1040 = vmatmul.mubr.msk.f32.vlgmr.msra.gmra.mrb[2].mxu1 %vm47_vm0, %v383_v12 }
 0x851   :  { %1118 = vmatpush3.bf16.msra.mxu1 %v1334_v5  ;;  %1061 = vmatprep.mubr.msk.f32.mxu1 %vm1270_vm1, %v1271_v1 }
 0x852   :  { %1119 = vmatprep.subr.bf16.mxu1 %v1269_v0 }
 0x855   :  { %1121 = vmatpush3.bf16.msra.mxu1 %v1341_v8 }
 0x856   :  { %1128 = vmatprep.subr.bf16.mxu1 %v1269_v0 }
 0x923   :  { %v457_v13 = vpop.f32.mrb[2].mxu1 }
 0x924   :  { %v468_v14 = vadd.f32 %v457_v13, %v1357_v10  ;;  %v1041_v15 = vpop.f32.mrb[3].mxu1  ;;  %v461_v17 = vadd.f32 %v457_v13, %v388_v16  ;;  %v709_v13 = vld [vmem:[#allocation3 + $0x30] sm:$0xff] }
 0x926   :  { %470 = vrot.lane.b32.xlu0 %v468_v14, %s1272_s11  ;;  %v949_v18 = vmul.f32 -1.442695, %v461_v17 }
 0x928   :  { %1163 = vpow2.f32 %v949_v18 }
 0x932   :  { %v1164_v19 = vpop.eup %1163 }
 0x933   :  { %v465_v20 = vadd.f32 1.0, %v1164_v19 }
 0x935   :  { %1165 = vrcp.f32 %v465_v20 }
 0x93f   :  { %v1166_v21 = vpop.eup %1165 }
 0x940   :  { %v480_v27 = vsub.f32 1.0, %v1166_v21  ;;  %v486_v29 = vmul.f32 %v1166_v21, %v380_v11 }
 0x998   :  { %v471_v22 = vpop.permute.xlu0 %470 }
 0x999   :  { %v473_v23 = vmul.f32 %v1166_v21, %v471_v22 }
 0x99b   :  { %475 = vrot.lane.b32.xlu1 %v473_v23, %s1272_s11 }
 0xa0d   :  { %v476_v24 = vpop.permute.xlu1 %475 }
 0xa0e   :  { %v478_v25 = vadd.f32 %v476_v24, %v388_v16 }
 0xa10   :  { %1167 = vtanh.f32 %v478_v25 }
 0xa1a   :  { %v1168_v26 = vpop.eup %1167 }
 0xa1b   :  { %482 = vrot.lane.b32.xlu0 %v1168_v26, %s1274_s12 }
 0xa8d   :  { %v483_v28 = vpop.permute.xlu0 %482 }
 0xa8e   :  { %v485_v30 = vmul.f32 %v483_v28, %v480_v27 }
 0xa90   :  { %v487_v31 = vadd.f32 %v486_v29, %v485_v30 }
 0xa92   :  { %489 = vrot.lane.b32.xlu1 %v487_v31, %s1274_s12 }
 0xb04   :  { %v490_v32 = vpop.permute.xlu1 %489 }
 0xb05   :  { %493 = vst.msk [vmem:[#allocation8 + $0x18] sm:$0xff] %vm47_vm0, %v490_v32  ;;  %1051 = vmatmul.mubr.msk.f32.vlgmr.msra.gmra.mrb[4].mxu0 %vm47_vm0, %v490_v32 }
 0xb06   :  { %1124 = vmatpush3.bf16.msra.mxu0 %v1334_v5  ;;  %1072 = vmatprep.mubr.msk.f32.mxu0 %vm1270_vm1, %v1271_v1 }
 0xb07   :  { %1125 = vmatprep.subr.bf16.mxu0 %v1269_v0 }
 0xb0a   :  { %1127 = vmatpush3.bf16.msra.mxu0 %v1341_v8 }
 0xbd8   :  { %v564_v33 = vpop.f32.mrb[4].mxu0 }
 0xbd9   :  { %v575_v34 = vadd.f32 %v564_v33, %v1357_v10  ;;  %v1052_v35 = vpop.f32.mrb[5].mxu0  ;;  %v568_v37 = vadd.f32 %v564_v33, %v495_v36  ;;  %v816_v33 = vld [vmem:[#allocation3 + $0x38] sm:$0xff] }
 0xbdb   :  { %577 = vrot.lane.b32.xlu0 %v575_v34, %s1272_s11  ;;  %v951_v38 = vmul.f32 -1.442695, %v568_v37 }
 0xbdd   :  { %1169 = vpow2.f32 %v951_v38 }
 0xbe7   :  { %v1170_v39 = vpop.eup %1169 }
 0xbe8   :  { %v572_v40 = vadd.f32 1.0, %v1170_v39 }
 0xbea   :  { %1171 = vrcp.f32 %v572_v40 }
 0xbf4   :  { %v1172_v41 = vpop.eup %1171 }
 0xbf5   :  { %v587_v47 = vsub.f32 1.0, %v1172_v41  ;;  %v593_v49 = vmul.f32 %v1172_v41, %v487_v31 }
 0xc4d   :  { %v578_v42 = vpop.permute.xlu0 %577 }
 0xc4e   :  { %v580_v43 = vmul.f32 %v1172_v41, %v578_v42 }
 0xc50   :  { %582 = vrot.lane.b32.xlu1 %v580_v43, %s1272_s11 }
 0xcc2   :  { %v583_v44 = vpop.permute.xlu1 %582 }
 0xcc3   :  { %v585_v45 = vadd.f32 %v583_v44, %v495_v36 }
 0xcc5   :  { %1173 = vtanh.f32 %v585_v45 }
 0xccf   :  { %v1174_v46 = vpop.eup %1173 }
 0xcd0   :  { %589 = vrot.lane.b32.xlu0 %v1174_v46, %s1274_s12 }
 0xd42   :  { %v590_v48 = vpop.permute.xlu0 %589 }
 0xd43   :  { %v592_v50 = vmul.f32 %v590_v48, %v587_v47 }
 0xd45   :  { %v594_v51 = vadd.f32 %v593_v49, %v592_v50 }
 0xd47   :  { %596 = vrot.lane.b32.xlu1 %v594_v51, %s1274_s12 }
 0xdb9   :  { %v597_v52 = vpop.permute.xlu1 %596 }
 0xdba   :  { %600 = vst.msk [vmem:[#allocation8 + $0x20] sm:$0xff] %vm47_vm0, %v597_v52  ;;  %1062 = vmatmul.mubr.msk.f32.vlgmr.msra.gmra.mrb[4].mxu1 %vm47_vm0, %v597_v52 }
 0xdbb   :  { %1130 = vmatpush3.bf16.msra.mxu1 %v1334_v5  ;;  %1083 = vmatprep.mubr.msk.f32.mxu1 %vm1270_vm1, %v1271_v1 }
 0xdbc   :  { %1131 = vmatprep.subr.bf16.mxu1 %v1269_v0 }
 0xdbf   :  { %1133 = vmatpush3.bf16.msra.mxu1 %v1341_v8 }
 0xe8d   :  { %v671_v53 = vpop.f32.mrb[4].mxu1 }
 0xe8e   :  { %v682_v54 = vadd.f32 %v671_v53, %v1357_v10  ;;  %v1063_v55 = vpop.f32.mrb[5].mxu1  ;;  %v675_v57 = vadd.f32 %v671_v53, %v602_v56 }
 0xe90   :  { %684 = vrot.lane.b32.xlu0 %v682_v54, %s1272_s11  ;;  %v953_v58 = vmul.f32 -1.442695, %v675_v57 }
 0xe92   :  { %1175 = vpow2.f32 %v953_v58 }
 0xe9c   :  { %v1176_v59 = vpop.eup %1175 }
 0xe9d   :  { %v679_v60 = vadd.f32 1.0, %v1176_v59 }
 0xe9f   :  { %1177 = vrcp.f32 %v679_v60 }
 0xea9   :  { %v1178_v5 = vpop.eup %1177 }
 0xeaa   :  { %v694_v63 = vsub.f32 1.0, %v1178_v5  ;;  %v700_v3 = vmul.f32 %v1178_v5, %v594_v51 }
 0xf02   :  { %v685_v61 = vpop.permute.xlu0 %684 }
 0xf03   :  { %v687_v1 = vmul.f32 %v1178_v5, %v685_v61 }
 0xf05   :  { %689 = vrot.lane.b32.xlu1 %v687_v1, %s1272_s11 }
 0xf77   :  { %v690_v0 = vpop.permute.xlu1 %689 }
 0xf78   :  { %v692_v8 = vadd.f32 %v690_v0, %v602_v56 }
 0xf7a   :  { %1179 = vtanh.f32 %v692_v8 }
 0xf84   :  { %v1180_v62 = vpop.eup %1179 }
 0xf85   :  { %696 = vrot.lane.b32.xlu0 %v1180_v62, %s1274_s12 }
 0xff7   :  { %v697_v2 = vpop.permute.xlu0 %696 }
 0xff8   :  { %v699_v4 = vmul.f32 %v697_v2, %v694_v63 }
 0xffa   :  { %v701_v6 = vadd.f32 %v700_v3, %v699_v4 }
 0xffc   :  { %703 = vrot.lane.b32.xlu1 %v701_v6, %s1274_s12 }
0x106e   :  { %v704_v7 = vpop.permute.xlu1 %703 }
0x106f   :  { %707 = vst.msk [vmem:[#allocation8 + $0x28] sm:$0xff] %vm47_vm0, %v704_v7  ;;  %1073 = vmatmul.mubr.msk.f32.vlgmr.msra.gmra.mrb[6].mxu0 %vm47_vm0, %v704_v7 }
0x1142   :  { %v778_v9 = vpop.f32.mrb[6].mxu0 }
0x1143   :  { %v789_v11 = vadd.f32 %v778_v9, %v1357_v10  ;;  %v1074_v12 = vpop.f32.mrb[7].mxu0  ;;  %v782_v14 = vadd.f32 %v778_v9, %v709_v13 }
0x1145   :  { %791 = vrot.lane.b32.xlu0 %v789_v11, %s1272_s11  ;;  %v955_v15 = vmul.f32 -1.442695, %v782_v14 }
0x1147   :  { %1181 = vpow2.f32 %v955_v15 }
0x1151   :  { %v1182_v16 = vpop.eup %1181 }
0x1152   :  { %v786_v17 = vadd.f32 1.0, %v1182_v16 }
0x1154   :  { %1183 = vrcp.f32 %v786_v17 }
0x115e   :  { %v1184_v18 = vpop.eup %1183 }
0x115f   :  { %v801_v24 = vsub.f32 1.0, %v1184_v18  ;;  %v807_v26 = vmul.f32 %v1184_v18, %v701_v6 }
0x11b7   :  { %v792_v19 = vpop.permute.xlu0 %791 }
0x11b8   :  { %v794_v20 = vmul.f32 %v1184_v18, %v792_v19 }
0x11ba   :  { %796 = vrot.lane.b32.xlu1 %v794_v20, %s1272_s11 }
0x122c   :  { %v797_v21 = vpop.permute.xlu1 %796 }
0x122d   :  { %v799_v22 = vadd.f32 %v797_v21, %v709_v13 }
0x122f   :  { %1185 = vtanh.f32 %v799_v22 }
0x1239   :  { %v1186_v23 = vpop.eup %1185 }
0x123a   :  { %803 = vrot.lane.b32.xlu0 %v1186_v23, %s1274_s12 }
0x12ac   :  { %v804_v25 = vpop.permute.xlu0 %803 }
0x12ad   :  { %v806_v27 = vmul.f32 %v804_v25, %v801_v24 }
0x12af   :  { %v808_v28 = vadd.f32 %v807_v26, %v806_v27 }
0x12b1   :  { %810 = vrot.lane.b32.xlu1 %v808_v28, %s1274_s12 }
0x1323   :  { %v811_v29 = vpop.permute.xlu1 %810 }
0x1324   :  { %814 = vst.msk [vmem:[#allocation8 + $0x30] sm:$0xff] %vm47_vm0, %v811_v29  ;;  %1084 = vmatmul.mubr.msk.f32.vlgmr.msra.gmra.mrb[6].mxu1 %vm47_vm0, %v811_v29 }
0x13f7   :  { %v885_v30 = vpop.f32.mrb[6].mxu1 }
0x13f8   :  { %v896_v31 = vadd.f32 %v885_v30, %v1357_v10  ;;  %v1085_v32 = vpop.f32.mrb[7].mxu1  ;;  %v889_v34 = vadd.f32 %v885_v30, %v816_v33 }
0x13fa   :  { %898 = vrot.lane.b32.xlu0 %v896_v31, %s1272_s11  ;;  %v957_v35 = vmul.f32 -1.442695, %v889_v34 }
0x13fc   :  { %1187 = vpow2.f32 %v957_v35 }
0x1406   :  { %v1188_v36 = vpop.eup %1187 }
0x1407   :  { %v893_v37 = vadd.f32 1.0, %v1188_v36 }
0x1409   :  { %1189 = vrcp.f32 %v893_v37 }
0x1413   :  { %v1190_v38 = vpop.eup %1189 }
0x1414   :  { %v908_v10 = vsub.f32 1.0, %v1190_v38  ;;  %v914_v45 = vmul.f32 %v1190_v38, %v808_v28 }
0x146c   :  { %v899_v39 = vpop.permute.xlu0 %898 }
0x146d   :  { %v901_v40 = vmul.f32 %v1190_v38, %v899_v39 }
0x146f   :  { %903 = vrot.lane.b32.xlu1 %v901_v40, %s1272_s11 }
0x14e1   :  { %v904_v41 = vpop.permute.xlu1 %903 }
0x14e2   :  { %v906_v42 = vadd.f32 %v904_v41, %v816_v33 }
0x14e4   :  { %1191 = vtanh.f32 %v906_v42 }
0x14ee   :  { %v1192_v43 = vpop.eup %1191 }
0x14ef   :  { %910 = vrot.lane.b32.xlu0 %v1192_v43, %s1274_s12 }
0x1561   :  { %v911_v44 = vpop.permute.xlu0 %910 }
0x1562   :  { %v913_v46 = vmul.f32 %v911_v44, %v908_v10 }
0x1564   :  { %v915_v47 = vadd.f32 %v914_v45, %v913_v46 }
0x1566   :  { %917 = vrot.lane.b32.xlu1 %v915_v47, %s1274_s12 }
0x15d8   :  { %v918_v48 = vpop.permute.xlu1 %917 }
0x15d9   :  { %921 = vst.msk [vmem:[#allocation8 + $0x38] sm:$0xff] %vm47_vm0, %v918_v48  ;;  %922 = vst.msk [vmem:[#allocation2] sm:$0xff] %vm47_vm0, %v918_v48 }
0x15da   :  { %1248 = shalt.err (!%p1245_p6)
}
0x15db   :  { %s1249_s18 = scalar_lea.hbm %s1461_s3, 1024 }
0x15dc   :  { %p1250_p7 = scmp.ne.s32.totalorder %s1461_s3, %s1249_s18  ;;  %p1253_p8 = scmp.lt.u32.totalorder %s1249_s18, %s1461_s3 }
0x15de   :  { %p1255_p9 = pnand %p1253_p8, %p1250_p7 }
0x15e0   :  { %1258 = shalt.err (!%p1255_p9)
}
0x15e1   :  { %934 = dma.vmem_to_hbm [thread:$0]  %s929_s14, 1024, %s1461_s3, [#allocation5], %s1266_s22, %s1266_s22, %s1267_s23  }
0x15e2   :  { %1263 = dma.done.wait [#allocation5], 1024  }
0x15e3   :  { %1264 = vsyncadd [#allocation5], 4294966272 }
0x15e4   :  { %938 = vsyncpa [#allocation4], 1 }
0x15e5   :  { %939 = vsyncpa [#allocation7], 1 }
0x15e6   :  { %940 = vsyncpa [#allocation5], 1 }

</bundles_post_ra>
